<compile_context>
chip_gen: v7x
topology: tpu7x:2x2x1
jax: 0.10.0
libtpu: 0.0.40
codegen_flags: <defaults>
</compile_context>

<pallas_src>
import functools

import jax
import jax.numpy as jnp
from jax import lax
from jax.experimental import pallas as pl
from jax.experimental.pallas import tpu as pltpu


def _conv_ln_kernel(x_ref, w_ref, g_ref, b_ref, o_ref, *, n_valid, eps):
    # x_ref: (1, KKC, HWp)   im2col columns for this batch element
    # w_ref: (Cout, KKC)     flattened conv weights
    # g_ref, b_ref: (Cout, HWp)  LayerNorm affine params (zero padded past H*W)
    # o_ref: (1, Cout, HWp)
    x = x_ref[0]                                        # (KKC, HWp)

    # Single contraction over K*K*Cin; result is lane-dense (Cout, HWp) in f32.
    acc = lax.dot_general(
        w_ref[...], x,
        dimension_numbers=(((1,), (0,)), ((), ())),
        preferred_element_type=jnp.float32)             # (Cout, HWp)

    # LayerNorm over the valid Cout*H*W elements (biased variance, single pass).
    # Padded lane columns of acc are exactly zero (zero-padded im2col input),
    # so full-array sums equal the sums over valid elements.
    s = jnp.sum(acc)
    ss = jnp.sum(acc * acc)
    mean = s / n_valid
    var = jnp.maximum(ss / n_valid - mean * mean, 0.0)
    inv = lax.rsqrt(var + eps)
    y = (acc - mean) * inv * g_ref[...] + b_ref[...]
    o_ref[0] = y.astype(o_ref.dtype)


def conv2d_with_layernorm(x_nchw, w_oihw, gamma_chw, beta_chw, *, eps=1e-5):
    """x_nchw: (N, Cin, H, W); w_oihw: (Cout, Cin, K, K); gamma/beta: (Cout, H, W)."""
    N, Cin, H, W = x_nchw.shape
    Cout, _, K, _ = w_oihw.shape
    p = K // 2
    HW = H * W
    HWp = pl.cdiv(HW, 128) * 128
    KKC = K * K * Cin

    # ---- glue (plain JAX): im2col to a lane-dense layout ----
    x_pad = jnp.pad(x_nchw, ((0, 0), (0, 0), (p, p), (p, p)))
    patches = [x_pad[:, :, kh:kh + H, kw:kw + W]
               for kh in range(K) for kw in range(K)]                 # each (N,Cin,H,W)
    x_cols = jnp.stack(patches, axis=1).reshape(N, KKC, HW)           # (kh,kw,cin) order
    x_cols = jnp.pad(x_cols, ((0, 0), (0, 0), (0, HWp - HW)))         # (N, KKC, HWp)

    w_mat = jnp.transpose(w_oihw, (0, 2, 3, 1)).reshape(Cout, KKC)    # matches (kh,kw,cin)
    g = jnp.pad(gamma_chw.reshape(Cout, HW), ((0, 0), (0, HWp - HW)))
    b = jnp.pad(beta_chw.reshape(Cout, HW), ((0, 0), (0, HWp - HW)))

    kernel = functools.partial(_conv_ln_kernel,
                               n_valid=float(Cout * HW), eps=eps)

    out_p = pl.pallas_call(
        kernel,
        out_shape=jax.ShapeDtypeStruct((N, Cout, HWp), x_nchw.dtype),
        grid_spec=pltpu.PrefetchScalarGridSpec(
            num_scalar_prefetch=0,
            grid=(N,),
            in_specs=[
                pl.BlockSpec((1, KKC, HWp), lambda n: (n, 0, 0)),
                pl.BlockSpec((Cout, KKC), lambda n: (0, 0)),
                pl.BlockSpec((Cout, HWp), lambda n: (0, 0)),
                pl.BlockSpec((Cout, HWp), lambda n: (0, 0)),
            ],
            out_specs=pl.BlockSpec((1, Cout, HWp), lambda n: (n, 0, 0)),
        ),
        compiler_params=pltpu.CompilerParams(
            dimension_semantics=("parallel",)),
    )(x_cols, w_mat, g, b)

    # Strip lane padding; result is already NCHW.
    return out_p[:, :, :HW].reshape(N, Cout, H, W)


def _reference(x_nchw, w_oihw, gamma_chw, beta_chw, eps=1e-5):
    # Pure-JAX reference (PyTorch semantics): conv (no bias, padding=K//2) + LayerNorm over (C,H,W).
    K = w_oihw.shape[-1]
    p = K // 2
    t = lax.conv_general_dilated(
        x_nchw, w_oihw, window_strides=(1, 1),
        padding=[(p, p), (p, p)],
        dimension_numbers=('NCHW', 'OIHW', 'NCHW'))
    mean = jnp.mean(t, axis=(1, 2, 3), keepdims=True)
    var = jnp.mean((t - mean) ** 2, axis=(1, 2, 3), keepdims=True)
    y = (t - mean) * lax.rsqrt(var + eps)
    return y * gamma_chw[None] + beta_chw[None]


if __name__ == "__main__":
    # Small shapes consistent with the module: LayerNorm((Cout, 28, 28)) forces H=W=28.
    N, Cin, Cout, K = 2, 4, 8, 3
    H = W = 28

    key = jax.random.PRNGKey(0)
    kx, kw, kg, kb = jax.random.split(key, 4)
    x = jax.random.normal(kx, (N, Cin, H, W), dtype=jnp.float32)
    # Conv2d weight (Cout, Cin, K, K); deterministic synthetic init.
    w = jax.random.normal(kw, (Cout, Cin, K, K), dtype=jnp.float32) * 0.1
    # LayerNorm affine params over (Cout, 28, 28).
    gamma = 1.0 + 0.05 * jax.random.normal(kg, (Cout, H, W), dtype=jnp.float32)
    beta = 0.05 * jax.random.normal(kb, (Cout, H, W), dtype=jnp.float32)

    out = conv2d_with_layernorm(x, w, gamma, beta)
    out = jax.block_until_ready(out)

    ref = _reference(x, w, gamma, beta)
    assert out.shape == (N, Cout, H, W)
    assert jnp.allclose(out, ref, atol=1e-4, rtol=1e-4), "mismatch vs reference"

    print("KERNEL_OK")
</pallas_src>

<mosaic_0001>
module attributes {stable_mosaic.version = 11 : i64} {
  func.func @_conv_ln_kernel(%arg0: i32, %arg1: memref<1x36x896xf32, #tpu.memory_space<vmem>>, %arg2: memref<8x36xf32, #tpu.memory_space<vmem>>, %arg3: memref<8x896xf32, #tpu.memory_space<vmem>>, %arg4: memref<8x896xf32, #tpu.memory_space<vmem>>, %arg5: memref<1x8x896xf32, #tpu.memory_space<vmem>>) attributes {dimension_semantics = [#tpu.dimension_semantics<parallel>], iteration_bounds = array<i64: 2>, scalar_prefetch = 0 : i64, scratch_operands = 0 : i64, tpu.core_type = #tpu.core_type<tc>, window_params = [{transform_indices = @transform_0, window_bounds = array<i64: 1, 36, 896>}, {pipeline_mode = #tpu.pipeline_mode<synchronous>, transform_indices = @transform_1, window_bounds = array<i64: 8, 36>}, {pipeline_mode = #tpu.pipeline_mode<synchronous>, transform_indices = @transform_2, window_bounds = array<i64: 8, 896>}, {pipeline_mode = #tpu.pipeline_mode<synchronous>, transform_indices = @transform_3, window_bounds = array<i64: 8, 896>}, {transform_indices = @transform_4, window_bounds = array<i64: 1, 8, 896>}]} {
    %c0 = arith.constant 0 : index
    %c0_0 = arith.constant 0 : index
    %c0_1 = arith.constant 0 : index
    %0 = vector.load %arg1[%c0, %c0_0, %c0_1] : memref<1x36x896xf32, #tpu.memory_space<vmem>>, vector<1x36x896xf32>
    %1 = vector.shape_cast %0 : vector<1x36x896xf32> to vector<36x896xf32>
    %c0_2 = arith.constant 0 : index
    %c0_3 = arith.constant 0 : index
    %2 = vector.load %arg2[%c0_2, %c0_3] : memref<8x36xf32, #tpu.memory_space<vmem>>, vector<8x36xf32>
    %cst = arith.constant dense<0.000000e+00> : vector<8x896xf32>
    %3 = tpu.matmul %2, %1, %cst {dimension_numbers = #tpu.dot_dimension_numbers<[1], [0], [0], [1], [0, 0, 1, 1], [], []>} : vector<8x36xf32>, vector<36x896xf32>, vector<8x896xf32> -> vector<8x896xf32>
    %4 = vector.shape_cast %3 : vector<8x896xf32> to vector<1x8x896xf32>
    %cst_4 = arith.constant dense<0.000000e+00> : vector<1xf32>
    %5 = vector.multi_reduction <add>, %4, %cst_4 [1, 2] : vector<1x8x896xf32> to vector<1xf32>
    %6 = vector.shape_cast %5 : vector<1xf32> to vector<1x1x1xf32>
    %7 = vector.extract %6[0, 0, 0] : f32 from vector<1x1x1xf32>
    %8 = arith.mulf %3, %3 : vector<8x896xf32>
    %9 = vector.shape_cast %8 : vector<8x896xf32> to vector<1x8x896xf32>
    %cst_5 = arith.constant dense<0.000000e+00> : vector<1xf32>
    %10 = vector.multi_reduction <add>, %9, %cst_5 [1, 2] : vector<1x8x896xf32> to vector<1xf32>
    %11 = vector.shape_cast %10 : vector<1xf32> to vector<1x1x1xf32>
    %12 = vector.extract %11[0, 0, 0] : f32 from vector<1x1x1xf32>
    %cst_6 = arith.constant 6.272000e+03 : f32
    %13 = arith.divf %7, %cst_6 : f32
    %cst_7 = arith.constant 6.272000e+03 : f32
    %14 = arith.divf %12, %cst_7 : f32
    %15 = arith.mulf %13, %13 : f32
    %16 = arith.subf %14, %15 : f32
    %cst_8 = arith.constant 0.000000e+00 : f32
    %17 = arith.maximumf %16, %cst_8 : f32
    %cst_9 = arith.constant 9.99999974E-6 : f32
    %18 = arith.addf %17, %cst_9 : f32
    %19 = math.rsqrt %18 : f32
    %20 = vector.broadcast %13 : f32 to vector<8x896xf32>
    %21 = arith.subf %3, %20 : vector<8x896xf32>
    %22 = vector.broadcast %19 : f32 to vector<8x896xf32>
    %23 = arith.mulf %21, %22 : vector<8x896xf32>
    %c0_10 = arith.constant 0 : index
    %c0_11 = arith.constant 0 : index
    %24 = vector.load %arg3[%c0_10, %c0_11] : memref<8x896xf32, #tpu.memory_space<vmem>>, vector<8x896xf32>
    %25 = arith.mulf %23, %24 : vector<8x896xf32>
    %c0_12 = arith.constant 0 : index
    %c0_13 = arith.constant 0 : index
    %26 = vector.load %arg4[%c0_12, %c0_13] : memref<8x896xf32, #tpu.memory_space<vmem>>, vector<8x896xf32>
    %27 = arith.addf %25, %26 : vector<8x896xf32>
    %c0_14 = arith.constant 0 : index
    %c0_15 = arith.constant 0 : index
    %c0_16 = arith.constant 0 : index
    %28 = vector.load %arg5[%c0_14, %c0_15, %c0_16] : memref<1x8x896xf32, #tpu.memory_space<vmem>>, vector<1x8x896xf32>
    %29 = vector.shape_cast %28 : vector<1x8x896xf32> to vector<8x896xf32>
    %30 = vector.shape_cast %27 : vector<8x896xf32> to vector<1x8x896xf32>
    tpu.vector_store %arg5[%c0_14, %c0_15, %c0_16], %30 {strides = array<i32>} : memref<1x8x896xf32, #tpu.memory_space<vmem>>, vector<1x8x896xf32>,
    return
  }
  func.func @transform_0(%arg0: i32) -> (i32, i32, i32) {
    %c0_i32 = arith.constant 0 : i32
    %c0_i32_0 = arith.constant 0 : i32
    %c0_i32_1 = arith.constant 0 : i32
    return %arg0, %c0_i32, %c0_i32_0 : i32, i32, i32
  }
  func.func @transform_1(%arg0: i32) -> (i32, i32) {
    %c0_i32 = arith.constant 0 : i32
    %c0_i32_0 = arith.constant 0 : i32
    %c0_i32_1 = arith.constant 0 : i32
    return %c0_i32, %c0_i32_0 : i32, i32
  }
  func.func @transform_2(%arg0: i32) -> (i32, i32) {
    %c0_i32 = arith.constant 0 : i32
    %c0_i32_0 = arith.constant 0 : i32
    %c0_i32_1 = arith.constant 0 : i32
    return %c0_i32, %c0_i32_0 : i32, i32
  }
  func.func @transform_3(%arg0: i32) -> (i32, i32) {
    %c0_i32 = arith.constant 0 : i32
    %c0_i32_0 = arith.constant 0 : i32
    %c0_i32_1 = arith.constant 0 : i32
    return %c0_i32, %c0_i32_0 : i32, i32
  }
  func.func @transform_4(%arg0: i32) -> (i32, i32, i32) {
    %c0_i32 = arith.constant 0 : i32
    %c0_i32_0 = arith.constant 0 : i32
    %c0_i32_1 = arith.constant 0 : i32
    return %arg0, %c0_i32, %c0_i32_0 : i32, i32, i32
  }
}

</mosaic_0001>

<bundles_post_ra>
// kernel: tpu_custom_call.1
= control target key start
LH: loop header
LB: loop body
LE: loop exit
PB: predicated region body
PF: predicated region fallthrough
CT: control target
= control target key end

     0   :  { %9 = vsyncpa [#allocation3], 0  ;;  %s1176_s0 = inlined_call_operand.vmem [shape: f32[2,36,896], index: 0, kind: input, shape index: {}]   ;;  %s1177_s1 = inlined_call_operand.vmem [shape: f32[8,36], index: 1, kind: input, shape index: {}]   ;;  %s1178_s2 = inlined_call_operand.vmem [shape: f32[8,896], index: 2, kind: input, shape index: {}]   ;;  %s1179_s3 = inlined_call_operand.vmem [shape: f32[8,896], index: 3, kind: input, shape index: {}]   ;;  %s1180_s4 = inlined_call_operand.hbm [shape: f32[2,8,896], index: 4, kind: output, shape index: {}]  }
   0x1   :  { %11 = vsyncpa [#allocation3 + $0x1], 0  ;;  %s932_s15 = smov 0   ;;  %s934_s16 = smov 0  }
   0x2   :  { %s936_s17 = smov 0   ;;  %s938_s18 = smov 0  }
   0x3 LB: > { %s953_s19 = sadd.s32 4294967295, %s900_s18   ;;  %s716_s20 = sadd.s32 4294967294, %s900_s18   ;;  %s900_s18 = sphi %s938_s18, %s1186_s18   ;;  %s896_s17 = sphi %s936_s17, %s1185_s17   ;;  %s892_s16 = sphi %s934_s16, %s1184_s16   ;;  %s888_s15 = sphi %s932_s15, %s1183_s15  }
   0x4   : > { %s957_s21 = sadd.s32 1, %s900_s18   ;;  %s113_s22 = sadd.s32 1, %s896_s17 }
   0x5   : > { %s110_s23 = ssub.s32 %s900_s18, %s957_s21  ;;  %p123_p0 = scmp.ne.s32.totalorder %s896_s17, %s892_s16 }
   0x6   : > { %p111_p1 = scmp.eq.s32.totalorder %s110_s23, 0  ;;  %p124_p2 = scmp.eq.s32.totalorder %s953_s19, 1 }
   0x7   : > { %p129_p3 = scmp.ne.s32.totalorder %s892_s16, %s888_s15  ;;  %p130_p4 = scmp.eq.s32.totalorder %s716_s20, 1 }
   0x8   : > { %s968_s24 = scalar_select %p111_p1, %s896_s17, %s113_s22  }
   0x9   : > { %p970_p5 = por %p124_p2, %p123_p0  ;;  %p974_p6 = por %p130_p4, %p129_p3 }
   0xa   : > { %p719_p7 = scmp.ge.s32.totalorder %s900_s18, 1  ;;  %p165_p8 = scmp.lt.s32.totalorder %s900_s18, 3 }
   0xc   : > { %p166_p9 = pnand %p719_p7, %p165_p8 }
   0xd   : > { %p191_p10 = scmp.lt.s32.totalorder (!%p166_p9), %s953_s19, 1  ;;  %v902_v0 = vmov (!%p166_p9), 0.0   ;;  %vm236_vm0 = vcmask (!%p166_p9), 1043456   ;;  %v231_v37 = vld [vmem:[%s1177_s1] sm:$0xff] (!%p166_p9)  ;;  %vm232_vm1 = vcmask (!%p166_p9), 293888   ;;  %v903_v47 = vmov (!%p166_p9), 0.0|0.0  }
   0xe   : > { %169 = sbr.rel (%p166_p9) target bundleno = 568 (0x238), region = 36  ;;  %322 = vmatprep.mubr.f32.mxu0 (!%p166_p9), %v902_v0  ;;  %393 = vmatprep.mubr.f32.mxu1 (!%p166_p9), %v902_v0  ;;  %vm904_vm2 = vmmov (!%p166_p9), 0   ;;  %s905_s14 = smov (!%p166_p9), 0.0  }
   0xf   : > { %s188_s23 = sand.u32 (!%p166_p9), 1, %s892_s16   ;;  %s906_s7 = smov (!%p166_p9), [#allocation2]  }
  0x15   : > { %s192_s27 = scalar_select %p191_p10, %s953_s19, 1 }
  0x17   : > { %s785_s28 = smul.u32 280, %s192_s27 }
  0x18   : > { %s784_s27 = smul.u32 56, %s188_s23 }
  0x19   : > { %s987_s5 = scalar_lea.vmem %s1176_s0, %s785_s28 }
  0x1a   : > { %v197_v1 = vld [vmem:[%s987_s5 + $0x8] sm:$0xff]  ;;  %v204_v2 = vld [vmem:[%s987_s5 + $0x40] sm:$0xff]  ;;  %v203_v5 = vld [vmem:[%s987_s5 + $0x38] sm:$0xff] }
  0x1b   : > { %v196_v3 = vld [vmem:[%s987_s5] sm:$0xff]  ;;  %v754_v4 = vpack.c.bf16 %v204_v2, %v197_v1  ;;  %v199_v6 = vld [vmem:[%s987_s5 + $0x18] sm:$0xff]  ;;  %v206_v7 = vld [vmem:[%s987_s5 + $0x50] sm:$0xff] }
  0x1c   : > { %v756_v8 = vpack.c.bf16 %v203_v5, %v196_v3  ;;  %v762_v9 = vpack.c.bf16 %v206_v7, %v199_v6  ;;  %v211_v10 = vld [vmem:[%s987_s5 + $0x78] sm:$0xff]  ;;  %v218_v11 = vld [vmem:[%s987_s5 + $0xb0] sm:$0xff]  ;;  %v205_v14 = vld [vmem:[%s987_s5 + $0x48] sm:$0xff] }
  0x1d   : > { %v198_v12 = vld [vmem:[%s987_s5 + $0x10] sm:$0xff]  ;;  %755 = vmatprep.subr.bf16.mxu0 %v754_v4  ;;  %v758_v13 = vpack.c.bf16 %v218_v11, %v211_v10  ;;  %v217_v16 = vld [vmem:[%s987_s5 + $0xa8] sm:$0xff]  ;;  %v220_v20 = vld [vmem:[%s987_s5 + $0xc0] sm:$0xff] }
  0x1e   : > { %v210_v15 = vld [vmem:[%s987_s5 + $0x70] sm:$0xff]  ;;  %757 = vmatpush1.bf16.msra.mxu0 %v756_v8  ;;  %763 = vmatprep.subr.bf16.mxu1 %v762_v9  ;;  %v764_v17 = vpack.c.bf16 %v205_v14, %v198_v12  ;;  %v213_v19 = vld [vmem:[%s987_s5 + $0x88] sm:$0xff]  ;;  %v212_v22 = vld [vmem:[%s987_s5 + $0x80] sm:$0xff] }
  0x1f   : > { %v760_v18 = vpack.c.bf16 %v217_v16, %v210_v15  ;;  %759 = vmatprep.subr.bf16.mxu0 %v758_v13  ;;  %v766_v21 = vpack.c.bf16 %v220_v20, %v213_v19  ;;  %v219_v23 = vld [vmem:[%s987_s5 + $0xb8] sm:$0xff]  ;;  %v225_v24 = vld [vmem:[%s987_s5 + $0xe8] sm:$0xf]  ;;  %v208_v27 = vld [vmem:[%s987_s5 + $0x60] sm:$0xff] }
  0x20   : > { %765 = vmatpush1.bf16.msra.mxu1 %v764_v17  ;;  %v768_v25 = vpack.c.bf16 %v219_v23, %v212_v22  ;;  %v201_v26 = vld [vmem:[%s987_s5 + $0x28] sm:$0xff]  ;;  %v200_v28 = vld [vmem:[%s987_s5 + $0x20] sm:$0xff]  ;;  %v207_v29 = vld [vmem:[%s987_s5 + $0x58] sm:$0xff] }
  0x21   : > { %767 = vmatprep.subr.bf16.mxu1 %v766_v21  ;;  %v224_v30 = vld [vmem:[%s987_s5 + $0xe0] sm:$0xf]  ;;  %v227_v31 = vld [vmem:[%s987_s5 + $0xf8] sm:$0xf]  ;;  %v770_v33 = vpack.c.bf16 %v208_v27, %v201_v26  ;;  %v222_v34 = vld [vmem:[%s987_s5 + $0xd0] sm:$0xff]  ;;  %v772_v38 = vpack.c.bf16 %v207_v29, %v200_v28 }
  0x22   : > { %761 = vmatpush1.bf16.msra.mxu0 %v760_v18  ;;  %v215_v32 = vld [vmem:[%s987_s5 + $0x98] sm:$0xff]  ;;  %v202_v35 = vld [vmem:[%s987_s5 + $0x30] sm:$0xff]  ;;  %v209_v36 = vld [vmem:[%s987_s5 + $0x68] sm:$0xff] }
  0x23   : > { %721 = vmatprep.subr.msk.mxu0 %vm236_vm0, %v225_v24  ;;  %v226_v39 = vld [vmem:[%s987_s5 + $0xf0] sm:$0xf]  ;;  %v221_v41 = vld [vmem:[%s987_s5 + $0xc8] sm:$0xff]  ;;  %v774_v42 = vpack.c.bf16 %v222_v34, %v215_v32  ;;  %v779_v43 = vpack.c.bf16 %v209_v36, %v202_v35  ;;  %v216_v44 = vld [vmem:[%s987_s5 + $0xa0] sm:$0xff] }
  0x24   : > { %769 = vmatpush1.bf16.msra.mxu1 %v768_v25  ;;  %v214_v40 = vld [vmem:[%s987_s5 + $0x90] sm:$0xff]  ;;  %v223_v45 = vld [vmem:[%s987_s5 + $0xd8] sm:$0xff]  ;;  %v229_v48 = vld [vmem:[%s987_s5 + $0x108] sm:$0xf] }
  0x25   : > { %724 = vmatprep.subr.msk.mxu1 %vm236_vm0, %v227_v31  ;;  %v776_v46 = vpack.c.bf16 %v221_v41, %v214_v40  ;;  %v782_v49 = vpack.c.bf16 %v223_v45, %v216_v44  ;;  %v228_v50 = vld [vmem:[%s987_s5 + $0x100] sm:$0xf]  ;;  %v230_v51 = vld [vmem:[%s987_s5 + $0x110] sm:$0xf]  ;;  %v608_v40 = vld [vmem:[%s1178_s2 + $0x8] sm:$0xff] }
  0x26   : > { %722 = vmatpush1.msk.msra.mxu0 %vm236_vm0, %v224_v30  ;;  %v611_v44 = vld [vmem:[%s1178_s2 + $0x20] sm:$0xff] }
  0x27   : > { %723 = vmatmul.mubr.msk.f32.vlgmr.msra.gmra.mrb[0].mxu0 %vm232_vm1, %v231_v37  ;;  %771 = vmatprep.subr.bf16.mxu0 %v770_v33 }
  0x28   : > { %773 = vmatpush1.bf16.msra.mxu0 %v772_v38  ;;  %725 = vmatpush1.msk.msra.mxu1 %vm236_vm0, %v226_v39  ;;  %v607_v39 = vld [vmem:[%s1178_s2] sm:$0xff] }
  0x29   : > { %726 = vmatmul.mubr.msk.f32.vlgmr.msra.gmra.mrb[0].mxu1 %vm232_vm1, %v231_v37  ;;  %778 = vmatprep.subr.bf16.mxu1 %v903_v47 }
  0x2a   : > { %775 = vmatprep.subr.bf16.mxu0 %v774_v42  ;;  %780 = vmatpush3.bf16.msra.mxu1 %v779_v43  ;;  %v609_v42 = vld [vmem:[%s1178_s2 + $0x10] sm:$0xff]  ;;  %v610_v43 = vld [vmem:[%s1178_s2 + $0x18] sm:$0xff] }
  0x2b   : > { %781 = vmatprep.subr.bf16.mxu1 %v903_v47  ;;  %464 = vmatprep.mubr.f32.mxu0 %v902_v0 }
  0x2c   : > { %777 = vmatpush1.bf16.msra.mxu0 %v776_v46  ;;  %751 = vmatprep.mubr.msk.f32.mxu1 %vm904_vm2, %v902_v0 }
  0x2d   : > { %727 = vmatprep.subr.msk.mxu0 %vm236_vm0, %v229_v48 }
  0x2e   : > { %783 = vmatpush3.bf16.msra.mxu1 %v782_v49  ;;  %v612_v49 = vld [vmem:[%s1178_s2 + $0x28] sm:$0xff] }
  0x2f   : > { %749 = vmatprep.subr.mxu1 %v902_v0 }
  0x30   : > { %728 = vmatpush1.msk.msra.mxu0 %vm236_vm0, %v228_v50  ;;  %v613_v50 = vld [vmem:[%s1178_s2 + $0x30] sm:$0xff] }
  0x31   : > { %729 = vmatmul.mubr.msk.f32.vlgmr.msra.gmra.mrb[2].mxu0 %vm232_vm1, %v231_v37 }
  0x32   : > { %750 = vmatpush3.msk.msra.mxu1 %vm236_vm0, %v230_v51  ;;  %v621_v51 = vld [vmem:[%s1179_s3] sm:$0xff] }
  0x33   : > { %752 = vmatmul.mubr.msk.f32.vlgmr.msra.gmra.mrb[2].mxu1 %vm232_vm1, %v231_v37 }
  0xfa   : > { %v1041_v52 = vpop.f32.mrb[0].mxu0 }
  0xfb   : > { %v556_v53 = vmul.f32 %v1041_v52, %v1041_v52  ;;  %v1045_v54 = vpop.f32.mrb[1].mxu0 }
  0xfc   : > { %v541_v55 = vadd.f32 %v1045_v54, %v1041_v52  ;;  %v557_v56 = vmul.f32 %v1045_v54, %v1045_v54  ;;  %v1051_v57 = vpop.f32.mrb[0].mxu1 }
  0xfd   : > { %v558_v58 = vmul.f32 %v1051_v57, %v1051_v57  ;;  %v1055_v59 = vpop.f32.mrb[1].mxu1 }
  0xfe   : > { %v563_v60 = vadd.f32 %v557_v56, %v556_v53  ;;  %v542_v61 = vadd.f32 %v541_v55, %v1051_v57  ;;  %v559_v62 = vmul.f32 %v1055_v59, %v1055_v59  ;;  %v622_v55 = vld [vmem:[%s1179_s3 + $0x8] sm:$0xff]  ;;  %v623_v56 = vld [vmem:[%s1179_s3 + $0x10] sm:$0xff] }
 0x100   : > { %v564_v63 = vadd.f32 %v563_v60, %v558_v58  ;;  %v543_v0 = vadd.f32 %v542_v61, %v1055_v59 }
 0x102   : > { %v565_v1 = vadd.f32 %v564_v63, %v559_v62  ;;  %v625_v62 = vld [vmem:[%s1179_s3 + $0x20] sm:$0xff]  ;;  %v626_v63 = vld [vmem:[%s1179_s3 + $0x28] sm:$0xff] }
 0x104   : > { %v1061_v2 = vpop.f32.mrb[2].mxu0 }
 0x105   : > { %v544_v3 = vadd.f32 %v543_v0, %v1061_v2  ;;  %v560_v4 = vmul.f32 %v1061_v2, %v1061_v2  ;;  %v1066_v5 = vpop.f32.mrb[3].mxu0  ;;  %v627_v0 = vld [vmem:[%s1179_s3 + $0x30] sm:$0xff] }
 0x106   : > { %v561_v6 = vmul.f32 %v1066_v5, %v1066_v5  ;;  %v1070_v7 = vpop.f32.mrb[2].mxu1 }
 0x107   : > { %v545_v8 = vadd.f32 %v544_v3, %v1066_v5  ;;  %v753_v9 = vpop.f32.mrb[3].mxu1  ;;  %v562_v10 = vmul.f32 %v1070_v7, %v1070_v7  ;;  %v566_v11 = vadd.f32 %v565_v1, %v560_v4 }
 0x109   : > { %v546_v12 = vadd.f32 %v545_v8, %v1070_v7  ;;  %v567_v13 = vadd.f32 %v566_v11, %v561_v6 }
 0x10b   : > { %547 = vadd.xlane.f32.xlu0 %v546_v12  ;;  %v568_v14 = vadd.f32 %v567_v13, %v562_v10 }
 0x10f   : > { %569 = vadd.xlane.f32.xlu0 %v568_v14 }
 0x198   : > { %v548_v15 = vpop.xlane.xlu0 %547 }
 0x199   : > { %v549_v16 = vrot.slane %v548_v15, 4 }
 0x19b   : > { %v550_v17 = vadd.f32 %v549_v16, %v548_v15 }
 0x19c   : > { %v570_v18 = vpop.xlane.xlu0 %569 }
 0x19d   : > { %v551_v19 = vrot.slane %v550_v17, 2  ;;  %v571_v20 = vrot.slane %v570_v18, 4 }
 0x19f   : > { %v572_v21 = vadd.f32 %v571_v20, %v570_v18  ;;  %v552_v22 = vadd.f32 %v551_v19, %v550_v17 }
 0x1a1   : > { %v573_v23 = vrot.slane %v572_v21, 2  ;;  %v553_v24 = vrot.slane %v552_v22, 1 }
 0x1a3   : > { %v574_v25 = vadd.f32 %v573_v23, %v572_v21  ;;  %v554_v26 = vadd.f32 %v553_v24, %v552_v22 }
 0x1a5   : > { %786 = vpush %v554_v26  ;;  %v575_v27 = vrot.slane %v574_v25, 1 }
 0x1a7   : > { %v576_v28 = vadd.f32 %v575_v27, %v574_v25 }
 0x1a9   : > { %788 = vpush %v576_v28 }
 0x1d6   : > { %s787_s8 = spop %786 }
 0x1d7   : > { %s580_s9 = smul.f32 0.00015943877, %s787_s8  ;;  %s842_s8 = sshll.u32 %s906_s7, 4  ;;  %s843_s8 = int_to_ptr.vmem [resolvable:$false] %s842_s8 }
 0x1d9   : > { %v591_v29 = vstv %s580_s9  ;;  %s584_s10 = smul.f32 %s580_s9, %s580_s9  ;;  %s844_s9 = scalar_lea.vmem %s843_s8, 1792 }
 0x1da   : > { %s789_s11 = spop %788  ;;  %v592_v30 = vsub.f32 %v1041_v52, %v591_v29  ;;  %v593_v31 = vsub.f32 %v1045_v54, %v591_v29  ;;  %v594_v32 = vsub.f32 %v1051_v57, %v591_v29  ;;  %v595_v33 = vsub.f32 %v1055_v59, %v591_v29  ;;  %v624_v57 = vld [vmem:[%s1179_s3 + $0x18] sm:$0xff] }
 0x1db   : > { %s583_s12 = smul.f32 0.00015943877, %s789_s11  ;;  %v596_v34 = vsub.f32 %v1061_v2, %v591_v29  ;;  %v597_v35 = vsub.f32 %v1066_v5, %v591_v29  ;;  %v598_v36 = vsub.f32 %v1070_v7, %v591_v29 }
 0x1dd   : > { %s585_s13 = ssub.f32 %s583_s12, %s584_s10  ;;  %s792_s10 = smul.u32 896, %s953_s19 }
 0x1df   : > { %s586_s20 = smax.f32 %s905_s14, %s585_s13  ;;  %s1132_s5 = scalar_lea.hbm %s1180_s4, %s792_s10 }
 0x1e0   : > { %s587_s22 = sadd.f32 1e-05, %s586_s20 }
 0x1e2   : > { %v588_v37 = vstv %s587_s22 }
 0x1e3   : > { %836 = vrsqrt.f32 %v588_v37 }
 0x1ed   : > { %v837_v38 = vpop.eup %836 }
 0x1ee   : > { %790 = vpush %v837_v38 }
 0x21f   : > { %s791_s28 = spop %790 }
 0x220   : > { %v599_v41 = vstv %s791_s28  ;;  %s190_s28 = scalar_lea.vmem [#allocation2], %s784_s27  ;;  %s643_s27 = scalar_lea.sflag [#allocation3], %s188_s23 }
 0x221   : > { %v600_v45 = vmul.f32 %v599_v41, %v592_v30  ;;  %v601_v46 = vmul.f32 %v599_v41, %v593_v31  ;;  %v602_v47 = vmul.f32 %v599_v41, %v594_v32  ;;  %v603_v48 = vmul.f32 %v599_v41, %v595_v33  ;;  %s657_s29 = sshll.u32 %s190_s28, 4  ;;  %s1134_s29 = int_to_ptr.vmem [resolvable:$true] %s657_s29 }
 0x222   : > { %v604_v52 = vmul.f32 %v599_v41, %v596_v34  ;;  %v605_v53 = vmul.f32 %v599_v41, %v597_v35  ;;  %v606_v54 = vmul.f32 %v599_v41, %v598_v36  ;;  %s838_s6 = scalar_lea.vmem %s1134_s29, 896  ;;  %p845_p0 = scmp.lt.s32.totalorder %s1134_s29, %s843_s8 }
 0x223   : > { %v614_v58 = vmul.f32 %v607_v39, %v600_v45  ;;  %v615_v59 = vmul.f32 %v608_v40, %v601_v46  ;;  %v616_v60 = vmul.f32 %v609_v42, %v602_v47  ;;  %v617_v61 = vmul.f32 %v610_v43, %v603_v48  ;;  %p839_p11 = scmp.ne.s32.totalorder %s1134_s29, %s838_s6  ;;  %p846_p1 = scmp.lt.s32.totalorder %s844_s9, %s838_s6 }
 0x224   : > { %v618_v1 = vmul.f32 %v611_v44, %v604_v52  ;;  %v619_v2 = vmul.f32 %v612_v49, %v605_v53  ;;  %v620_v3 = vmul.f32 %v613_v50, %v606_v54 }
 0x225   : > { %v628_v4 = vadd.f32 %v621_v51, %v614_v58  ;;  %v629_v5 = vadd.f32 %v622_v55, %v615_v59  ;;  %v630_v6 = vadd.f32 %v623_v56, %v616_v60  ;;  %v631_v7 = vadd.f32 %v624_v57, %v617_v61  ;;  %p840_p12 = pnand %p839_p11, %p970_p5  ;;  %p847_p2 = por %p846_p1, %p845_p0 }
 0x226   : > { %v632_v8 = vadd.f32 %v625_v62, %v618_v1  ;;  %v633_v9 = vadd.f32 %v626_v63, %v619_v2  ;;  %v634_v10 = vadd.f32 %v627_v0, %v620_v3 }
 0x227   : > { %635 = vst [vmem:[%s190_s28] sm:$0xff] %v628_v4  ;;  %636 = vst [vmem:[%s190_s28 + $0x8] sm:$0xff] %v629_v5  ;;  %p841_p13 = pneg %p840_p12 }
 0x228   : > { %637 = vst [vmem:[%s190_s28 + $0x10] sm:$0xff] %v630_v6  ;;  %638 = vst [vmem:[%s190_s28 + $0x18] sm:$0xff] %v631_v7 }
 0x229   : > { %639 = vst [vmem:[%s190_s28 + $0x20] sm:$0xff] %v632_v8  ;;  %640 = vst [vmem:[%s190_s28 + $0x28] sm:$0xff] %v633_v9  ;;  %p848_p3 = pnand %p847_p2, %p841_p13 }
 0x22a   : > { %641 = vst [vmem:[%s190_s28 + $0x30] sm:$0xff] %v634_v10 }
 0x22b   : > { %851 = shalt.err (!%p848_p3)
}
 0x22c   : > { %s852_s23 = scalar_lea.hbm %s1132_s5, 896  ;;  %s856_s12 = scalar_lea.hbm %s1180_s4, 1792 }
 0x22d   : > { %p853_p4 = scmp.ne.s32.totalorder %s1132_s5, %s852_s23  ;;  %p857_p9 = scmp.lt.u32.totalorder %s1132_s5, %s1180_s4 }
 0x22e   : > { %p858_p10 = scmp.lt.u32.totalorder %s856_s12, %s852_s23  ;;  %p860_p12 = scmp.lt.u32.totalorder %s852_s23, %s1132_s5 }
 0x22f   : > { %p854_p7 = pnand %p853_p4, %p970_p5 }
 0x230   : > { %p859_p11 = por %p858_p10, %p857_p9 }
 0x231   : > { %p855_p8 = pneg %p854_p7 }
 0x232   : > { %p861_p13 = por %p860_p12, %p859_p11 }
 0x234   : > { %p862_p0 = pnand %p861_p13, %p855_p8 }
 0x236   : > { %865 = shalt.err (!%p862_p0)
}
 0x237   : > { %793 = dma.vmem_to_hbm [thread:$0]  (%p970_p5), %s1134_s29, 896, %s1132_s5, %s643_s27  }
 0x238 PF: > { %p799_p1 = scmp.ge.s32.totalorder %s900_s18, 2  ;;  %s669_s20 = sand.u32 1, %s888_s15  }
 0x239   : > { %s670_s22 = scalar_lea.sflag [#allocation3], %s669_s20 }
 0x23a   : > { %p796_p2 = pnand %p799_p1, %p974_p6 }
 0x23c   : > { %883 = dma.done.wait (!%p796_p2), %s670_s22, 896  }
 0x23d   : > { %885 = vsyncadd (!%p796_p2), %s670_s22, 4294966400  ;;  %p14_p3 = scmp.ge.s32.totalorder %s957_s21, 4   ;;  %s1183_s15 = smov %s892_s16 }
 0x23e   : > { %s1184_s16 = smov %s896_s17  ;;  %s1185_s17 = smov %s968_s24 }
 0x23f   : > { %s1186_s18 = smov %s957_s21  ;;  %16 = sbr.rel (!%p14_p3) target bundleno = 3 (0x3), region = 71 }
 0x246   :  { %675 = vsyncpa [#allocation3], 1 }
 0x247   :  { %677 = vsyncpa [#allocation3 + $0x1], 1 }

</bundles_post_ra>
